<compile_context>
chip_gen: v7x
topology: tpu7x:2x2x1
jax: 0.10.0
libtpu: 0.0.40
codegen_flags: <defaults>
</compile_context>

<pallas_src>
import jax
import jax.numpy as jnp
from jax import lax
from jax.experimental import pallas as pl
from jax.experimental.pallas import tpu as pltpu

NUM_GROUPS = 2
EPS = 1e-5  # nn.GroupNorm default (ctor eps=1e-6 is ignored by the module)


def _round_up(x, m):
    return ((x + m - 1) // m) * m


def _groupnorm_kernel(x_ref, gamma_ref, beta_ref, avg_ref, o_ref):
    # x_ref:   (TR, L) lane-dense tile of packed features.
    # avg_ref: (L, L) block-diagonal averaging matrix, A[i, j] = 1/seg iff
    #          lanes i and j belong to the same (point, group) segment.
    x = x_ref[...]
    x32 = x.astype(jnp.float32)
    avg = avg_ref[...]

    if x_ref.dtype == jnp.bfloat16:
        # Native-rate bf16 MXU path; elementwise math stays in f32.
        lhs_mean = x
        lhs_ex2 = (x32 * x32).astype(jnp.bfloat16)
        dot_kwargs = dict(preferred_element_type=jnp.float32)
    else:
        # f32 path: HIGHEST precision so the segmented mean keeps f32 accuracy.
        lhs_mean = x32
        lhs_ex2 = x32 * x32
        dot_kwargs = dict(preferred_element_type=jnp.float32,
                          precision=lax.Precision.HIGHEST)

    # Segmented reduce + broadcast-back fused into MXU matmuls (avg is tiny and
    # stays resident; same RHS for both dots).
    mean = jnp.dot(lhs_mean, avg, **dot_kwargs)
    ex2 = jnp.dot(lhs_ex2, avg, **dot_kwargs)

    # One-pass moments; clamp guards against tiny negative variance from
    # cancellation.  rsqrt goes to the EUP (free slot).
    var = jnp.maximum(ex2 - mean * mean, 0.0)
    y = (x32 - mean) * lax.rsqrt(var + EPS)

    # gamma/beta are f32 + lane-tiled in the wrapper; broadcast over rows.
    y = y * gamma_ref[...] + beta_ref[...]
    o_ref[...] = y.astype(o_ref.dtype)


def minkowski_group_norm(feats, gamma, beta, *, row_tile=1024):
    """GroupNorm(2, C) over sparse features.

    feats: [N, C] feature matrix (f32 or bf16; elementwise compute is f32),
    gamma/beta: [C] affine params.  Returns [N, C] in feats.dtype.
    row_tile: packed-row tile (multiple of 8).  Keep <= 2048 to stay inside the
    default scoped VMEM on v5e; larger values need vmem_limit_bytes and a
    v7x-aware budget (64 MiB physical per TC there).
    """
    n, c = feats.shape
    assert c % NUM_GROUPS == 0, "channels must be divisible by num_groups=2"
    assert row_tile % 8 == 0
    seg = c // NUM_GROUPS

    if 128 % c == 0:
        # Lane-dense packing: per_row points share one 128-wide row.
        lane = 128
        per_row = lane // c
        c_pad = c
    else:
        # Irregular channel count: pad channels to a multiple of 128 so the
        # output stays lane-dense (padded lanes are zeroed via avg/gamma/beta).
        per_row = 1
        c_pad = _round_up(c, 128)
        lane = c_pad

    x = feats
    if c_pad != c:
        x = jnp.pad(x, ((0, 0), (0, c_pad - c)))

    # Minimal row pad so the flat features fold into (m, lane).  Exact-fit
    # inputs skip the pad entirely (zero extra HBM passes).
    n_pad = _round_up(n, per_row)
    if n_pad != n:
        x = jnp.pad(x, ((0, n_pad - n), (0, 0)))
    m = (n_pad * c_pad) // lane
    x = x.reshape(m, lane)  # row-major contiguous -> free view

    # Tile selection: ragged grid via pl.cdiv (no pad-to-tile-multiple); keep
    # >= 2 grid steps when m >= 16 so both v7x TensorCores get work.
    if m <= 15:
        tile = m  # single block == full array dims (allowed even if m % 8 != 0)
    elif m <= row_tile:
        tile = _round_up(-(-m // 2), 8)
    else:
        tile = row_tile
    grid = (pl.cdiv(m, tile),)

    # Hoisted f32 casts + lane tiling / padding of affine params (done once).
    g32 = gamma.astype(jnp.float32)
    b32 = beta.astype(jnp.float32)
    if c_pad != c:
        g32 = jnp.pad(g32, (0, c_pad - c))
        b32 = jnp.pad(b32, (0, c_pad - c))
    gamma_lane = jnp.tile(g32, per_row).reshape(1, lane)
    beta_lane = jnp.tile(b32, per_row).reshape(1, lane)

    # Constant block-diagonal averaging matrix: A[i, j] = 1/seg iff lanes i, j
    # belong to the same (point, group) segment; padded lanes contribute zero.
    idx = jnp.arange(lane)
    ch = idx % c_pad
    point = idx // c_pad
    valid = ch < c
    gid = point * NUM_GROUPS + ch // seg
    same = (gid[:, None] == gid[None, :]) & valid[:, None] & valid[None, :]
    mat_dtype = jnp.bfloat16 if feats.dtype == jnp.bfloat16 else jnp.float32
    avg = jnp.where(same, 1.0 / seg, 0.0).astype(mat_dtype)

    out = pl.pallas_call(
        _groupnorm_kernel,
        out_shape=jax.ShapeDtypeStruct((m, lane), feats.dtype),
        grid_spec=pltpu.PrefetchScalarGridSpec(
            num_scalar_prefetch=0,
            grid=grid,
            in_specs=[
                pl.BlockSpec((tile, lane), lambda i: (i, 0)),
                # Constant index maps: gamma/beta/avg are DMA'd once and kept
                # resident across grid steps (block index never changes).
                pl.BlockSpec((1, lane), lambda i: (0, 0)),
                pl.BlockSpec((1, lane), lambda i: (0, 0)),
                pl.BlockSpec((lane, lane), lambda i: (0, 0)),
            ],
            out_specs=pl.BlockSpec((tile, lane), lambda i: (i, 0)),
        ),
        compiler_params=pltpu.CompilerParams(
            dimension_semantics=("parallel",)),
    )(x, gamma_lane, beta_lane, avg)

    out = out.reshape(n_pad, c_pad)
    if n_pad != n or c_pad != c:
        out = out[:n, :c]
    return out


def _reference(feats, gamma, beta):
    n, c = feats.shape
    x = feats.astype(jnp.float32).reshape(n, NUM_GROUPS, c // NUM_GROUPS)
    mu = jnp.mean(x, axis=-1, keepdims=True)
    var = jnp.mean((x - mu) ** 2, axis=-1, keepdims=True)
    y = (x - mu) / jnp.sqrt(var + EPS)
    y = y.reshape(n, c)
    return y * gamma[None, :].astype(jnp.float32) + beta[None, :].astype(jnp.float32)


def _check(feats, gamma, beta, row_tile, atol, rtol):
    out = jax.block_until_ready(
        minkowski_group_norm(feats, gamma, beta, row_tile=row_tile))
    ref = _reference(feats, gamma, beta)
    assert out.shape == feats.shape
    assert out.dtype == feats.dtype
    assert jnp.allclose(out.astype(jnp.float32), ref, atol=atol, rtol=rtol), (
        "mismatch vs reference")


if __name__ == "__main__":
    key = jax.random.PRNGKey(0)
    k_x, k_g, k_b, k_x2, k_x3 = jax.random.split(key, 5)

    # 1) Small sparse-point count, C=8 (2 groups of 4): packed lane-dense path,
    #    single block, row pad path exercised.
    N, C = 100, 8
    feats = jax.random.normal(k_x, (N, C), dtype=jnp.float32)
    gamma = 1.0 + 0.1 * jax.random.normal(k_g, (C,), dtype=jnp.float32)
    beta = 0.1 * jax.random.normal(k_b, (C,), dtype=jnp.float32)
    _check(feats, gamma, beta, row_tile=1024, atol=1e-4, rtol=1e-4)

    # 2) Multi-tile ragged grid (m=63, tile=32 -> grid=2, last tile ragged).
    feats2 = jax.random.normal(k_x2, (1000, C), dtype=jnp.float32)
    _check(feats2, gamma, beta, row_tile=32, atol=1e-4, rtol=1e-4)

    # 3) Irregular channel count (C=24, groups of 12): channel-pad fallback,
    #    lane-dense output, 2 grid steps.
    C3 = 24
    feats3 = jax.random.normal(k_x3, (50, C3), dtype=jnp.float32)
    gamma3 = 1.0 + 0.1 * jax.random.normal(k_g, (C3,), dtype=jnp.float32)
    beta3 = 0.1 * jax.random.normal(k_b, (C3,), dtype=jnp.float32)
    _check(feats3, gamma3, beta3, row_tile=1024, atol=1e-4, rtol=1e-4)

    # 4) bf16 features: native-rate bf16 MXU path (relaxed tolerance).
    feats4 = feats2[:200].astype(jnp.bfloat16)
    _check(feats4, gamma, beta, row_tile=1024, atol=5e-2, rtol=5e-2)

    # TODO(synk): SparseTensor re-wrapping (coordinate_map_key /
    # coordinate_manager) is metadata plumbing with no Pallas equivalent; only
    # the feature transform is computed here.
    print("KERNEL_OK")
</pallas_src>

<mosaic_0001>
module attributes {stable_mosaic.version = 11 : i64} {
  func.func @_groupnorm_kernel(%arg0: i32, %arg1: memref<7x128xf32, #tpu.memory_space<vmem>>, %arg2: memref<1x128xf32, #tpu.memory_space<vmem>>, %arg3: memref<1x128xf32, #tpu.memory_space<vmem>>, %arg4: memref<128x128xf32, #tpu.memory_space<vmem>>, %arg5: memref<7x128xf32, #tpu.memory_space<vmem>>) attributes {dimension_semantics = [#tpu.dimension_semantics<parallel>], iteration_bounds = array<i64: 1>, scalar_prefetch = 0 : i64, scratch_operands = 0 : i64, tpu.core_type = #tpu.core_type<tc>, window_params = [{transform_indices = @transform_0, window_bounds = array<i64: 7, 128>}, {pipeline_mode = #tpu.pipeline_mode<synchronous>, transform_indices = @transform_1, window_bounds = array<i64: 1, 128>}, {pipeline_mode = #tpu.pipeline_mode<synchronous>, transform_indices = @transform_2, window_bounds = array<i64: 1, 128>}, {pipeline_mode = #tpu.pipeline_mode<synchronous>, transform_indices = @transform_3, window_bounds = array<i64: 128, 128>}, {transform_indices = @transform_4, window_bounds = array<i64: 7, 128>}]} {
    %c0 = arith.constant 0 : index
    %c0_0 = arith.constant 0 : index
    %0 = vector.load %arg1[%c0, %c0_0] : memref<7x128xf32, #tpu.memory_space<vmem>>, vector<7x128xf32>
    %c0_1 = arith.constant 0 : index
    %c0_2 = arith.constant 0 : index
    %1 = vector.load %arg4[%c0_1, %c0_2] : memref<128x128xf32, #tpu.memory_space<vmem>>, vector<128x128xf32>
    %2 = arith.mulf %0, %0 : vector<7x128xf32>
    %cst = arith.constant dense<0.000000e+00> : vector<7x128xf32>
    %3 = tpu.matmul %0, %1, %cst {dimension_numbers = #tpu.dot_dimension_numbers<[1], [0], [0], [1], [0, 0, 1, 1], [], []>, precision = #tpu.contract_precision<fp32>} : vector<7x128xf32>, vector<128x128xf32>, vector<7x128xf32> -> vector<7x128xf32>
    %cst_3 = arith.constant dense<0.000000e+00> : vector<7x128xf32>
    %4 = tpu.matmul %2, %1, %cst_3 {dimension_numbers = #tpu.dot_dimension_numbers<[1], [0], [0], [1], [0, 0, 1, 1], [], []>, precision = #tpu.contract_precision<fp32>} : vector<7x128xf32>, vector<128x128xf32>, vector<7x128xf32> -> vector<7x128xf32>
    %5 = arith.mulf %3, %3 : vector<7x128xf32>
    %6 = arith.subf %4, %5 : vector<7x128xf32>
    %cst_4 = arith.constant 0.000000e+00 : f32
    %7 = vector.broadcast %cst_4 : f32 to vector<7x128xf32>
    %8 = arith.maximumf %6, %7 : vector<7x128xf32>
    %9 = arith.subf %0, %3 : vector<7x128xf32>
    %cst_5 = arith.constant 9.99999974E-6 : f32
    %10 = vector.broadcast %cst_5 : f32 to vector<7x128xf32>
    %11 = arith.addf %8, %10 : vector<7x128xf32>
    %12 = math.rsqrt %11 : vector<7x128xf32>
    %13 = arith.mulf %9, %12 : vector<7x128xf32>
    %c0_6 = arith.constant 0 : index
    %c0_7 = arith.constant 0 : index
    %14 = vector.load %arg2[%c0_6, %c0_7] : memref<1x128xf32, #tpu.memory_space<vmem>>, vector<1x128xf32>
    %15 = vector.broadcast %14 : vector<1x128xf32> to vector<7x128xf32>
    %16 = arith.mulf %13, %15 : vector<7x128xf32>
    %c0_8 = arith.constant 0 : index
    %c0_9 = arith.constant 0 : index
    %17 = vector.load %arg3[%c0_8, %c0_9] : memref<1x128xf32, #tpu.memory_space<vmem>>, vector<1x128xf32>
    %18 = vector.broadcast %17 : vector<1x128xf32> to vector<7x128xf32>
    %19 = arith.addf %16, %18 : vector<7x128xf32>
    %c0_10 = arith.constant 0 : index
    %c0_11 = arith.constant 0 : index
    %20 = vector.load %arg5[%c0_10, %c0_11] : memref<7x128xf32, #tpu.memory_space<vmem>>, vector<7x128xf32>
    tpu.vector_store %arg5[%c0_10, %c0_11], %19 {strides = array<i32>} : memref<7x128xf32, #tpu.memory_space<vmem>>, vector<7x128xf32>,
    return
  }
  func.func @transform_0(%arg0: i32) -> (i32, i32) {
    %c0_i32 = arith.constant 0 : i32
    %c0_i32_0 = arith.constant 0 : i32
    return %arg0, %c0_i32 : i32, i32
  }
  func.func @transform_1(%arg0: i32) -> (i32, i32) {
    %c0_i32 = arith.constant 0 : i32
    %c0_i32_0 = arith.constant 0 : i32
    %c0_i32_1 = arith.constant 0 : i32
    return %c0_i32, %c0_i32_0 : i32, i32
  }
  func.func @transform_2(%arg0: i32) -> (i32, i32) {
    %c0_i32 = arith.constant 0 : i32
    %c0_i32_0 = arith.constant 0 : i32
    %c0_i32_1 = arith.constant 0 : i32
    return %c0_i32, %c0_i32_0 : i32, i32
  }
  func.func @transform_3(%arg0: i32) -> (i32, i32) {
    %c0_i32 = arith.constant 0 : i32
    %c0_i32_0 = arith.constant 0 : i32
    %c0_i32_1 = arith.constant 0 : i32
    return %c0_i32, %c0_i32_0 : i32, i32
  }
  func.func @transform_4(%arg0: i32) -> (i32, i32) {
    %c0_i32 = arith.constant 0 : i32
    %c0_i32_0 = arith.constant 0 : i32
    return %arg0, %c0_i32 : i32, i32
  }
}

</mosaic_0001>

<bundles_post_ra>
// kernel: tpu_custom_call.1
= control target key start
LH: loop header
LB: loop body
LE: loop exit
PB: predicated region body
PF: predicated region fallthrough
CT: control target
= control target key end

     0   :  { %9 = vsyncpa [#allocation3], 0  ;;  %s2842_s0 = inlined_call_operand.hbm [shape: f32[7,128], index: 0, kind: input, shape index: {}]   ;;  %s2843_s1 = inlined_call_operand.vmem [shape: f32[1,128], index: 1, kind: input, shape index: {}]   ;;  %s2844_s2 = inlined_call_operand.vmem [shape: f32[1,128], index: 2, kind: input, shape index: {}]   ;;  %s2845_s3 = inlined_call_operand.hbm [shape: f32[128,128], index: 3, kind: input, shape index: {}]   ;;  %s2846_s4 = inlined_call_operand.hbm [shape: f32[7,128], index: 4, kind: output, shape index: {}]  }
   0x1   :  { %10 = vsyncpa [#allocation6], 0 }
   0x2   :  { %11 = vsyncpa [#allocation4], 0  ;;  %s2400_s15 = smov [#allocation2]   ;;  %s2401_s17 = smov [#allocation5]  }
   0x3   :  { %s18_s16 = sshll.u32 %s2400_s15, 4  ;;  %s31_s18 = sshll.u32 %s2401_s17, 4  ;;  %s19_s16 = int_to_ptr.vmem [resolvable:$true] %s18_s16  ;;  %s2433_s18 = int_to_ptr.vmem [resolvable:$true] %s31_s18 }
   0x4   :  { %s2328_s21 = scalar_lea.hbm %s2842_s0, 128 }
   0x5   :  { %p2329_p0 = scmp.ne.s32.totalorder %s2842_s0, %s2328_s21  ;;  %p2332_p1 = scmp.lt.u32.totalorder %s2328_s21, %s2842_s0 }
   0x7   :  { %p2334_p2 = pnand %p2332_p1, %p2329_p0 }
   0x9   :  { %2337 = shalt.err (!%p2334_p2)
}
   0xa   :  { %s2338_s26 = scalar_lea.vmem %s19_s16, 128  ;;  %p2343_p4 = scmp.lt.s32.totalorder %s19_s16, %s19_s16 }
   0xb   :  { %p2339_p3 = scmp.ne.s32.totalorder %s19_s16, %s2338_s26  ;;  %p2344_p5 = scmp.lt.s32.totalorder %s2338_s26, %s2338_s26 }
   0xd   :  { %p2345_p6 = por %p2344_p5, %p2343_p4 }
   0xf   :  { %p2346_p7 = pnand %p2345_p6, %p2339_p3 }
  0x11   :  { %2349 = shalt.err (!%p2346_p7)
}
  0x12   :  { %21 = dma.hbm_to_vmem [thread:$0]  %s2842_s0, 128, %s19_s16, [#allocation3]  }
  0x13   :  { %s2350_s5 = scalar_lea.hbm %s2845_s3, 2048 }
  0x14   :  { %p2351_p8 = scmp.ne.s32.totalorder %s2845_s3, %s2350_s5  ;;  %p2354_p9 = scmp.lt.u32.totalorder %s2350_s5, %s2845_s3 }
  0x16   :  { %p2356_p10 = pnand %p2354_p9, %p2351_p8 }
  0x18   :  { %2359 = shalt.err (!%p2356_p10)
}
  0x19   :  { %s2360_s10 = scalar_lea.vmem %s2433_s18, 2048  ;;  %p2365_p12 = scmp.lt.s32.totalorder %s2433_s18, %s2433_s18 }
  0x1a   :  { %p2361_p11 = scmp.ne.s32.totalorder %s2433_s18, %s2360_s10  ;;  %p2366_p13 = scmp.lt.s32.totalorder %s2360_s10, %s2360_s10 }
  0x1c   :  { %p2367_p0 = por %p2366_p13, %p2365_p12 }
  0x1e   :  { %p2368_p1 = pnand %p2367_p0, %p2361_p11 }
  0x20   :  { %2371 = shalt.err (!%p2368_p1)
}
  0x21   :  { %s2402_s0 = smov 128   ;;  %s2403_s11 = smov 8  }
  0x22   :  { %37 = dma.hbm_to_vmem [thread:$0]  %s2845_s3, 2048, %s2433_s18, [#allocation6], %s2402_s0, %s2402_s0, %s2403_s11  }
  0x23   :  { %2394 = dma.done.wait [#allocation3], 128  }
  0x24   :  { %2395 = vsyncadd [#allocation3], 4294967168 }
  0x25   :  { %2396 = dma.done.wait [#allocation6], 2048  }
  0x26   :  { %2397 = vsyncadd [#allocation6], 4294965248  ;;  %v2404_v0 = vmov 0.0|0.0   ;;  %vm2405_vm0 = vmmov 0   ;;  %v2406_v1 = vmov 0.0   ;;  %v45_v2 = vld [vmem:[#allocation5] sm:$0xff] }
  0x27   :  { %2010 = vmatprep.subr.bf16.mxu0 %v2404_v0  ;;  %2154 = vmatprep.subr.bf16.mxu1 %v2404_v0  ;;  %v46_v3 = vld [vmem:[#allocation5 + $0x8] sm:$0xff]  ;;  %v47_v4 = vld [vmem:[#allocation5 + $0x10] sm:$0xff]  ;;  %v63_v5 = vand.u32 4294901760, %v45_v2  ;;  %v48_v7 = vld [vmem:[#allocation5 + $0x18] sm:$0xff]  ;;  %s2407_s17 = smov [#allocation7]  }
  0x28   :  { %1622 = vmatprep.mubr.msk.f32.mxu0 %vm2405_vm0, %v2406_v1  ;;  %1832 = vmatprep.mubr.msk.f32.mxu1 %vm2405_vm0, %v2406_v1  ;;  %v66_v6 = vand.u32 4294901760, %v46_v3  ;;  %v69_v8 = vand.u32 4294901760, %v47_v4  ;;  %v72_v9 = vand.u32 4294901760, %v48_v7  ;;  %v2470_v10 = vld [vmem:[#allocation5 + $0x20] sm:$0xff]  ;;  %v2472_v11 = vld [vmem:[#allocation5 + $0x28] sm:$0xff]  ;;  %v2484_v16 = vld [vmem:[#allocation5 + $0x30] sm:$0xff] }
  0x29   :  { %v75_v14 = vand.u32 4294901760, %v2470_v10  ;;  %v78_v15 = vand.u32 4294901760, %v2472_v11  ;;  %v2486_v17 = vld [vmem:[#allocation5 + $0x38] sm:$0xff]  ;;  %v81_v20 = vand.u32 4294901760, %v2484_v16  ;;  %v53_v22 = vld [vmem:[#allocation5 + $0x40] sm:$0xff]  ;;  %v54_v23 = vld [vmem:[#allocation5 + $0x48] sm:$0xff]  ;;  %v2507_v35 = vsub.f32 %v45_v2, %v63_v5 }
  0x2a   :  { %v2474_v12 = vpack.c.bf16 %v66_v6, %v63_v5  ;;  %v2478_v13 = vpack.c.bf16 %v72_v9, %v69_v8  ;;  %v2488_v18 = vld [vmem:[#allocation2] sm:$0x7f]  ;;  %v84_v21 = vand.u32 4294901760, %v2486_v17  ;;  %v55_v26 = vld [vmem:[#allocation5 + $0x50] sm:$0xff]  ;;  %v57_v28 = vld [vmem:[#allocation5 + $0x60] sm:$0xff]  ;;  %v87_v30 = vand.u32 4294901760, %v53_v22 }
  0x2b   :  { %v2492_v19 = vpack.c.bf16 %v78_v15, %v75_v14  ;;  %v2499_v24 = vand.u32 4294901760, %v2488_v18  ;;  %v61_v25 = vmul.f32 %v2488_v18, %v2488_v18  ;;  %v56_v27 = vld [vmem:[#allocation5 + $0x58] sm:$0xff]  ;;  %v90_v31 = vand.u32 4294901760, %v54_v23  ;;  %v58_v32 = vld [vmem:[#allocation5 + $0x68] sm:$0xff]  ;;  %v59_v33 = vld [vmem:[#allocation5 + $0x70] sm:$0xff]  ;;  %s1374_s18 = sshll.u32 %s2407_s17, 4  ;;  %s1375_s18 = int_to_ptr.vmem [resolvable:$true] %s1374_s18 }
  0x2c   :  { %2012 = vmatpush3.bf16.msra.mxu0 %v2474_v12  ;;  %2156 = vmatpush3.bf16.msra.mxu1 %v2474_v12  ;;  %v2505_v29 = vpack.c.bf16 %v84_v21, %v81_v20  ;;  %v60_v34 = vld [vmem:[#allocation5 + $0x78] sm:$0xff]  ;;  %v2515_v37 = vsub.f32 %v46_v3, %v66_v6  ;;  %v2517_v38 = vsub.f32 %v47_v4, %v69_v8  ;;  %v93_v39 = vand.u32 4294901760, %v55_v26  ;;  %s2372_s19 = scalar_lea.vmem %s1375_s18, 128  ;;  %p2377_p3 = scmp.lt.s32.totalorder %s1375_s18, %s1375_s18 }
  0x2d   :  { %2013 = vmatprep.subr.bf16.mxu0 %v2404_v0  ;;  %2157 = vmatprep.subr.bf16.mxu1 %v2404_v0  ;;  %v2513_v36 = vsub.f32 %v2488_v18, %v2499_v24  ;;  %v96_v40 = vand.u32 4294901760, %v56_v27  ;;  %v2519_v41 = vand.u32 4294901760, %v61_v25  ;;  %v99_v42 = vand.u32 4294901760, %v57_v28  ;;  %p2373_p2 = scmp.ne.s32.totalorder %s1375_s18, %s2372_s19  ;;  %p2378_p4 = scmp.lt.s32.totalorder %s2372_s19, %s2372_s19 }
  0x2e   :  { %v102_v43 = vand.u32 4294901760, %v58_v32  ;;  %v105_v44 = vand.u32 4294901760, %v59_v33  ;;  %v108_v45 = vand.u32 4294901760, %v60_v34  ;;  %v2523_v46 = vpack.c.bf16 %v90_v31, %v87_v30 }
  0x2f   :  { %v156_v47 = vand.u32 4294901760, %v2507_v35  ;;  %v2848_v48 = vand.u32 4294901760, %v2513_v36  ;;  %v163_v49 = vand.u32 4294901760, %v2515_v37  ;;  %v170_v50 = vand.u32 4294901760, %v2517_v38  ;;  %p2379_p5 = por %p2378_p4, %p2377_p3 }
  0x30   :  { %2015 = vmatpush3.bf16.msra.mxu0 %v2478_v13  ;;  %2159 = vmatpush3.bf16.msra.mxu1 %v2478_v13  ;;  %v2531_v51 = vsub.f32 %v48_v7, %v72_v9  ;;  %v2534_v52 = vsub.f32 %v61_v25, %v2519_v41  ;;  %v2536_v53 = vpack.c.bf16 %v96_v40, %v93_v39 }
  0x31   :  { %2016 = vmatprep.subr.bf16.mxu0 %v2404_v0  ;;  %2160 = vmatprep.subr.bf16.mxu1 %v2404_v0  ;;  %v2538_v54 = vpack.c.bf16 %v102_v43, %v99_v42  ;;  %v2540_v55 = vpack.c.bf16 %v108_v45, %v105_v44  ;;  %v157_v56 = vsub.f32 %v2507_v35, %v156_v47  ;;  %p2380_p6 = pnand %p2379_p5, %p2373_p2 }
  0x32   :  { %v2546_v57 = vsub.f32 %v2470_v10, %v75_v14  ;;  %v2549_v58 = vsub.f32 %v2472_v11, %v78_v15  ;;  %v146_v59 = vsub.f32 %v2513_v36, %v2848_v48  ;;  %v164_v60 = vsub.f32 %v2515_v37, %v163_v49 }
  0x33   :  { %v2558_v61 = vsub.f32 %v2517_v38, %v170_v50  ;;  %v177_v62 = vand.u32 4294901760, %v2531_v51  ;;  %v2847_v63 = vand.u32 4294901760, %v2534_v52  ;;  %v2563_v2 = vsub.f32 %v2484_v16, %v81_v20 }
  0x34   :  { %2018 = vmatpush3.bf16.msra.mxu0 %v2492_v19  ;;  %2162 = vmatpush3.bf16.msra.mxu1 %v2492_v19  ;;  %v2566_v3 = vsub.f32 %v2486_v17, %v84_v21  ;;  %v2568_v4 = vsub.f32 %v53_v22, %v87_v30  ;;  %v2570_v5 = vsub.f32 %v54_v23, %v90_v31  ;;  %v184_v9 = vand.u32 4294901760, %v2546_v57 }
  0x35   :  { %2019 = vmatprep.subr.bf16.mxu0 %v2404_v0  ;;  %2163 = vmatprep.subr.bf16.mxu1 %v2404_v0  ;;  %v2572_v6 = vsub.f32 %v55_v26, %v93_v39  ;;  %v2574_v7 = vsub.f32 %v56_v27, %v96_v40  ;;  %v2576_v8 = vsub.f32 %v57_v28, %v99_v42  ;;  %v158_v15 = vand.u32 4294901760, %v157_v56 }
  0x36   :  { %v2581_v10 = vsub.f32 %v58_v32, %v102_v43  ;;  %v2583_v11 = vsub.f32 %v59_v33, %v105_v44  ;;  %v2585_v14 = vsub.f32 %v60_v34, %v108_v45  ;;  %v165_v16 = vand.u32 4294901760, %v164_v60 }
  0x37   :  { %v178_v17 = vsub.f32 %v2531_v51, %v177_v62  ;;  %v191_v20 = vand.u32 4294901760, %v2549_v58  ;;  %v787_v21 = vsub.f32 %v2534_v52, %v2847_v63  ;;  %v198_v22 = vand.u32 4294901760, %v2563_v2 }
  0x38   :  { %2021 = vmatpush3.bf16.msra.mxu0 %v2505_v29  ;;  %2165 = vmatpush3.bf16.msra.mxu1 %v2505_v29  ;;  %v205_v23 = vand.u32 4294901760, %v2566_v3  ;;  %v212_v25 = vand.u32 4294901760, %v2568_v4  ;;  %v219_v26 = vand.u32 4294901760, %v2570_v5  ;;  %v226_v27 = vand.u32 4294901760, %v2572_v6 }
  0x39   :  { %2022 = vmatprep.subr.bf16.mxu0 %v2404_v0  ;;  %2166 = vmatprep.subr.bf16.mxu1 %v2404_v0  ;;  %v233_v28 = vand.u32 4294901760, %v2574_v7  ;;  %v240_v30 = vand.u32 4294901760, %v2576_v8  ;;  %v247_v31 = vand.u32 4294901760, %v2581_v10  ;;  %v254_v32 = vand.u32 4294901760, %v2583_v11 }
  0x3a   :  { %v2849_v33 = vand.u32 4294901760, %v2585_v14  ;;  %v2606_v34 = vpack.c.bf16 %v163_v49, %v156_v47  ;;  %v2610_v39 = vpack.c.bf16 %v177_v62, %v170_v50  ;;  %v2612_v40 = vpack.c.bf16 %v191_v20, %v184_v9 }
  0x3b   :  { %v2614_v42 = vpack.c.bf16 %v205_v23, %v198_v22  ;;  %v2616_v43 = vpack.c.bf16 %v219_v26, %v212_v25  ;;  %v2618_v44 = vpack.c.bf16 %v233_v28, %v226_v27  ;;  %v2620_v45 = vpack.c.bf16 %v247_v31, %v240_v30 }
  0x3c   :  { %2024 = vmatpush3.bf16.msra.mxu0 %v2523_v46  ;;  %2168 = vmatpush3.bf16.msra.mxu1 %v2523_v46  ;;  %v2626_v47 = vpack.c.bf16 %v2849_v33, %v254_v32  ;;  %v147_v49 = vand.u32 4294901760, %v146_v59  ;;  %v788_v56 = vand.u32 4294901760, %v787_v21  ;;  %v185_v50 = vsub.f32 %v2546_v57, %v184_v9 }
  0x3d   :  { %2025 = vmatprep.subr.bf16.mxu0 %v2404_v0  ;;  %2169 = vmatprep.subr.bf16.mxu1 %v2404_v0  ;;  %v192_v60 = vsub.f32 %v2549_v58, %v191_v20  ;;  %v2035_v62 = vpack.c.bf16 %v165_v16, %v158_v15  ;;  %v172_v63 = vand.u32 4294901760, %v2558_v61  ;;  %v179_v48 = vand.u32 4294901760, %v178_v17 }
  0x3e   :  { %v186_v59 = vand.u32 4294901760, %v185_v50  ;;  %v199_v20 = vsub.f32 %v2563_v2, %v198_v22  ;;  %v206_v33 = vsub.f32 %v2566_v3, %v205_v23  ;;  %v227_v17 = vsub.f32 %v2572_v6, %v226_v27 }
  0x3f   :  { %v193_v21 = vand.u32 4294901760, %v192_v60  ;;  %v2038_v9 = vpack.c.bf16 %v179_v48, %v172_v63  ;;  %v213_v48 = vsub.f32 %v2568_v4, %v212_v25  ;;  %v220_v63 = vsub.f32 %v2570_v5, %v219_v26 }
  0x40   :  { %2027 = vmatpush3.bf16.msra.mxu0 %v2536_v53  ;;  %2171 = vmatpush3.bf16.msra.mxu1 %v2536_v53  ;;  %v200_v15 = vand.u32 4294901760, %v199_v20  ;;  %v207_v16 = vand.u32 4294901760, %v206_v33  ;;  %v241_v25 = vsub.f32 %v2576_v8, %v240_v30  ;;  %v228_v33 = vand.u32 4294901760, %v227_v17 }
  0x41   :  { %2028 = vmatprep.subr.bf16.mxu0 %v2404_v0  ;;  %2172 = vmatprep.subr.bf16.mxu1 %v2404_v0  ;;  %v2041_v61 = vpack.c.bf16 %v193_v21, %v186_v59  ;;  %v214_v23 = vand.u32 4294901760, %v213_v48  ;;  %v248_v27 = vsub.f32 %v2581_v10, %v247_v31  ;;  %v255_v30 = vsub.f32 %v2583_v11, %v254_v32 }
  0x42   :  { %v2044_v22 = vpack.c.bf16 %v207_v16, %v200_v15  ;;  %v242_v60 = vand.u32 4294901760, %v241_v25  ;;  %v2850_v59 = vand.u32 4294901760, %v2585_v14  ;;  %v2062_v15 = vpack.c.bf16 %v2531_v51, %v2517_v38 }
  0x43   :  { %v2071_v38 = vpack.c.bf16 %v2570_v5, %v2568_v4  ;;  %v2074_v51 = vpack.c.bf16 %v2574_v7, %v2572_v6 }
  0x44   :  { %2030 = vmatpush3.bf16.msra.mxu0 %v2538_v54  ;;  %2174 = vmatpush3.bf16.msra.mxu1 %v2538_v54  ;;  %v262_v21 = vsub.f32 %v2585_v14, %v2850_v59 }
  0x45   :  { %2031 = vmatprep.subr.bf16.mxu0 %v2404_v0  ;;  %2175 = vmatprep.subr.bf16.mxu1 %v2404_v0 }
  0x46   :  { %v263_v20 = vand.u32 4294901760, %v262_v21 }
  0x48   :  { %2033 = vmatpush3.bf16.msra.mxu0 %v2540_v55  ;;  %2177 = vmatpush3.bf16.msra.mxu1 %v2540_v55 }
  0x49   :  { %2034 = vmatprep.subr.bf16.mxu0 %v2404_v0  ;;  %2178 = vmatprep.subr.bf16.mxu1 %v2404_v0 }
  0x4b   :  { %1623 = vmatmul.mubr.f32.vlgmr.msra.gmra.mrb[0].mxu0 %v147_v49  ;;  %1833 = vmatmul.mubr.f32.vlgmr.msra.gmra.mrb[0].mxu1 %v788_v56  ;;  %v221_v49 = vand.u32 4294901760, %v220_v63  ;;  %v234_v56 = vsub.f32 %v2574_v7, %v233_v28 }
  0x4c   :  { %2036 = vmatpush3.bf16.msra.mxu0 %v2035_v62  ;;  %2180 = vmatpush3.bf16.msra.mxu1 %v2035_v62  ;;  %v249_v62 = vand.u32 4294901760, %v248_v27 }
  0x4d   :  { %2037 = vmatprep.subr.bf16.mxu0 %v2404_v0  ;;  %2181 = vmatprep.subr.bf16.mxu1 %v2404_v0  ;;  %v2047_v26 = vpack.c.bf16 %v221_v49, %v214_v23  ;;  %v235_v50 = vand.u32 4294901760, %v234_v56 }
  0x4e   :  { %1657 = vmatprep.mubr.msk.f32.mxu0 %vm2405_vm0, %v2406_v1  ;;  %1867 = vmatprep.mubr.msk.f32.mxu1 %vm2405_vm0, %v2406_v1  ;;  %v2053_v31 = vpack.c.bf16 %v249_v62, %v242_v60 }
  0x4f   :  { %v2050_v28 = vpack.c.bf16 %v235_v50, %v228_v33 }
  0x50   :  { %2039 = vmatpush3.bf16.msra.mxu0 %v2038_v9  ;;  %2183 = vmatpush3.bf16.msra.mxu1 %v2038_v9  ;;  %v256_v9 = vand.u32 4294901760, %v255_v30 }
  0x51   :  { %2040 = vmatprep.subr.bf16.mxu0 %v2404_v0  ;;  %2184 = vmatprep.subr.bf16.mxu1 %v2404_v0 }
  0x52   :  { %v2056_v32 = vpack.c.bf16 %v263_v20, %v256_v9 }
  0x54   :  { %2042 = vmatpush3.bf16.msra.mxu0 %v2041_v61  ;;  %2186 = vmatpush3.bf16.msra.mxu1 %v2041_v61  ;;  %v2059_v61 = vpack.c.bf16 %v2515_v37, %v2507_v35  ;;  %v2065_v35 = vpack.c.bf16 %v2549_v58, %v2546_v57  ;;  %v2068_v37 = vpack.c.bf16 %v2566_v3, %v2563_v2  ;;  %v2851_v2 = vand.u32 4294901760, %v2513_v36 }
  0x55   :  { %2043 = vmatprep.subr.bf16.mxu0 %v2404_v0  ;;  %2187 = vmatprep.subr.bf16.mxu1 %v2404_v0  ;;  %v2077_v57 = vpack.c.bf16 %v2581_v10, %v2576_v8  ;;  %v2080_v58 = vpack.c.bf16 %v2585_v14, %v2583_v11  ;;  %v2852_v3 = vand.u32 4294901760, %v2534_v52 }
  0x58   :  { %2045 = vmatpush3.bf16.msra.mxu0 %v2044_v22  ;;  %2189 = vmatpush3.bf16.msra.mxu1 %v2044_v22 }
  0x59   :  { %2046 = vmatprep.subr.bf16.mxu0 %v2404_v0  ;;  %2190 = vmatprep.subr.bf16.mxu1 %v2404_v0 }
  0x5c   :  { %2048 = vmatpush3.bf16.msra.mxu0 %v2047_v26  ;;  %2192 = vmatpush3.bf16.msra.mxu1 %v2047_v26 }
  0x5d   :  { %2049 = vmatprep.subr.bf16.mxu0 %v2404_v0  ;;  %2193 = vmatprep.subr.bf16.mxu1 %v2404_v0 }
  0x60   :  { %2051 = vmatpush3.bf16.msra.mxu0 %v2050_v28  ;;  %2195 = vmatpush3.bf16.msra.mxu1 %v2050_v28 }
  0x61   :  { %2052 = vmatprep.subr.bf16.mxu0 %v2404_v0  ;;  %2196 = vmatprep.subr.bf16.mxu1 %v2404_v0 }
  0x64   :  { %2054 = vmatpush3.bf16.msra.mxu0 %v2053_v31  ;;  %2198 = vmatpush3.bf16.msra.mxu1 %v2053_v31 }
  0x65   :  { %2055 = vmatprep.subr.bf16.mxu0 %v2404_v0  ;;  %2199 = vmatprep.subr.bf16.mxu1 %v2404_v0 }
  0x68   :  { %2057 = vmatpush3.bf16.msra.mxu0 %v2056_v32  ;;  %2201 = vmatpush3.bf16.msra.mxu1 %v2056_v32 }
  0x69   :  { %2058 = vmatprep.subr.bf16.mxu0 %v2404_v0  ;;  %2202 = vmatprep.subr.bf16.mxu1 %v2404_v0 }
  0x6b   :  { %1658 = vmatmul.mubr.f32.vlgmr.msra.gmra.mrb[0].mxu0 %v2499_v24  ;;  %1868 = vmatmul.mubr.f32.vlgmr.msra.gmra.mrb[0].mxu1 %v2519_v41 }
  0x6c   :  { %2060 = vmatpush3.bf16.msra.mxu0 %v2059_v61  ;;  %2204 = vmatpush3.bf16.msra.mxu1 %v2059_v61 }
  0x6d   :  { %2061 = vmatprep.subr.bf16.mxu0 %v2404_v0  ;;  %2205 = vmatprep.subr.bf16.mxu1 %v2404_v0 }
  0x6e   :  { %1692 = vmatprep.mubr.msk.f32.mxu0 %vm2405_vm0, %v2406_v1  ;;  %1902 = vmatprep.mubr.msk.f32.mxu1 %vm2405_vm0, %v2406_v1 }
  0x70   :  { %2063 = vmatpush3.bf16.msra.mxu0 %v2062_v15  ;;  %2207 = vmatpush3.bf16.msra.mxu1 %v2062_v15 }
  0x71   :  { %2064 = vmatprep.subr.bf16.mxu0 %v2404_v0  ;;  %2208 = vmatprep.subr.bf16.mxu1 %v2404_v0 }
  0x74   :  { %2066 = vmatpush3.bf16.msra.mxu0 %v2065_v35  ;;  %2210 = vmatpush3.bf16.msra.mxu1 %v2065_v35 }
  0x75   :  { %2067 = vmatprep.subr.bf16.mxu0 %v2404_v0  ;;  %2211 = vmatprep.subr.bf16.mxu1 %v2404_v0 }
  0x78   :  { %2069 = vmatpush3.bf16.msra.mxu0 %v2068_v37  ;;  %2213 = vmatpush3.bf16.msra.mxu1 %v2068_v37 }
  0x79   :  { %2070 = vmatprep.subr.bf16.mxu0 %v2404_v0  ;;  %2214 = vmatprep.subr.bf16.mxu1 %v2404_v0 }
  0x7c   :  { %2072 = vmatpush3.bf16.msra.mxu0 %v2071_v38  ;;  %2216 = vmatpush3.bf16.msra.mxu1 %v2071_v38 }
  0x7d   :  { %2073 = vmatprep.subr.bf16.mxu0 %v2404_v0  ;;  %2217 = vmatprep.subr.bf16.mxu1 %v2404_v0 }
  0x80   :  { %2075 = vmatpush3.bf16.msra.mxu0 %v2074_v51  ;;  %2219 = vmatpush3.bf16.msra.mxu1 %v2074_v51 }
  0x81   :  { %2076 = vmatprep.subr.bf16.mxu0 %v2404_v0  ;;  %2220 = vmatprep.subr.bf16.mxu1 %v2404_v0 }
  0x84   :  { %2078 = vmatpush3.bf16.msra.mxu0 %v2077_v57  ;;  %2222 = vmatpush3.bf16.msra.mxu1 %v2077_v57 }
  0x85   :  { %2079 = vmatprep.subr.bf16.mxu0 %v2404_v0  ;;  %2223 = vmatprep.subr.bf16.mxu1 %v2404_v0 }
  0x88   :  { %2081 = vmatpush3.bf16.msra.mxu0 %v2080_v58  ;;  %2225 = vmatpush3.bf16.msra.mxu1 %v2080_v58 }
  0x89   :  { %2082 = vmatprep.subr.bf16.mxu0 %v2404_v0  ;;  %2226 = vmatprep.subr.bf16.mxu1 %v2404_v0 }
  0x8b   :  { %1693 = vmatmul.mubr.f32.vlgmr.msra.gmra.mrb[0].mxu0 %v2513_v36  ;;  %1903 = vmatmul.mubr.f32.vlgmr.msra.gmra.mrb[0].mxu1 %v2534_v52 }
  0x8c   :  { %2084 = vmatpush3.bf16.msra.mxu0 %v2474_v12  ;;  %2228 = vmatpush3.bf16.msra.mxu1 %v2474_v12 }
  0x8d   :  { %2085 = vmatprep.subr.bf16.mxu0 %v2404_v0  ;;  %2229 = vmatprep.subr.bf16.mxu1 %v2404_v0 }
  0x8e   :  { %1727 = vmatprep.mubr.msk.f32.mxu0 %vm2405_vm0, %v2406_v1  ;;  %1937 = vmatprep.mubr.msk.f32.mxu1 %vm2405_vm0, %v2406_v1 }
  0x90   :  { %2087 = vmatpush3.bf16.msra.mxu0 %v2478_v13  ;;  %2231 = vmatpush3.bf16.msra.mxu1 %v2478_v13 }
  0x91   :  { %2088 = vmatprep.subr.bf16.mxu0 %v2404_v0  ;;  %2232 = vmatprep.subr.bf16.mxu1 %v2404_v0 }
  0x94   :  { %2090 = vmatpush3.bf16.msra.mxu0 %v2492_v19  ;;  %2234 = vmatpush3.bf16.msra.mxu1 %v2492_v19 }
  0x95   :  { %2091 = vmatprep.subr.bf16.mxu0 %v2404_v0  ;;  %2235 = vmatprep.subr.bf16.mxu1 %v2404_v0 }
  0x98   :  { %2093 = vmatpush3.bf16.msra.mxu0 %v2505_v29  ;;  %2237 = vmatpush3.bf16.msra.mxu1 %v2505_v29 }
  0x99   :  { %2094 = vmatprep.subr.bf16.mxu0 %v2404_v0  ;;  %2238 = vmatprep.subr.bf16.mxu1 %v2404_v0 }
  0x9c   :  { %2096 = vmatpush3.bf16.msra.mxu0 %v2523_v46  ;;  %2240 = vmatpush3.bf16.msra.mxu1 %v2523_v46 }
  0x9d   :  { %2097 = vmatprep.subr.bf16.mxu0 %v2404_v0  ;;  %2241 = vmatprep.subr.bf16.mxu1 %v2404_v0 }
  0xa0   :  { %2099 = vmatpush3.bf16.msra.mxu0 %v2536_v53  ;;  %2243 = vmatpush3.bf16.msra.mxu1 %v2536_v53 }
  0xa1   :  { %2100 = vmatprep.subr.bf16.mxu0 %v2404_v0  ;;  %2244 = vmatprep.subr.bf16.mxu1 %v2404_v0 }
  0xa4   :  { %2102 = vmatpush3.bf16.msra.mxu0 %v2538_v54  ;;  %2246 = vmatpush3.bf16.msra.mxu1 %v2538_v54 }
  0xa5   :  { %2103 = vmatprep.subr.bf16.mxu0 %v2404_v0  ;;  %2247 = vmatprep.subr.bf16.mxu1 %v2404_v0 }
  0xa8   :  { %2105 = vmatpush3.bf16.msra.mxu0 %v2540_v55  ;;  %2249 = vmatpush3.bf16.msra.mxu1 %v2540_v55 }
  0xa9   :  { %2106 = vmatprep.subr.bf16.mxu0 %v2404_v0  ;;  %2250 = vmatprep.subr.bf16.mxu1 %v2404_v0 }
  0xab   :  { %1728 = vmatmul.mubr.f32.vlgmr.msra.gmra.mrb[0].mxu0 %v2851_v2  ;;  %1938 = vmatmul.mubr.f32.vlgmr.msra.gmra.mrb[0].mxu1 %v2852_v3 }
  0xac   :  { %2108 = vmatpush3.bf16.msra.mxu0 %v2606_v34  ;;  %2252 = vmatpush3.bf16.msra.mxu1 %v2606_v34 }
  0xad   :  { %2109 = vmatprep.subr.bf16.mxu0 %v2404_v0  ;;  %2253 = vmatprep.subr.bf16.mxu1 %v2404_v0 }
  0xae   :  { %1762 = vmatprep.mubr.msk.f32.mxu0 %vm2405_vm0, %v2406_v1  ;;  %1972 = vmatprep.mubr.msk.f32.mxu1 %vm2405_vm0, %v2406_v1 }
  0xb0   :  { %2111 = vmatpush3.bf16.msra.mxu0 %v2610_v39  ;;  %2255 = vmatpush3.bf16.msra.mxu1 %v2610_v39 }
  0xb1   :  { %2112 = vmatprep.subr.bf16.mxu0 %v2404_v0  ;;  %2256 = vmatprep.subr.bf16.mxu1 %v2404_v0 }
  0xb4   :  { %2114 = vmatpush3.bf16.msra.mxu0 %v2612_v40  ;;  %2258 = vmatpush3.bf16.msra.mxu1 %v2612_v40 }
  0xb5   :  { %2115 = vmatprep.subr.bf16.mxu0 %v2404_v0  ;;  %2259 = vmatprep.subr.bf16.mxu1 %v2404_v0 }
  0xb8   :  { %2117 = vmatpush3.bf16.msra.mxu0 %v2614_v42  ;;  %2261 = vmatpush3.bf16.msra.mxu1 %v2614_v42 }
  0xb9   :  { %2118 = vmatprep.subr.bf16.mxu0 %v2404_v0  ;;  %2262 = vmatprep.subr.bf16.mxu1 %v2404_v0 }
  0xbc   :  { %2120 = vmatpush3.bf16.msra.mxu0 %v2616_v43  ;;  %2264 = vmatpush3.bf16.msra.mxu1 %v2616_v43 }
  0xbd   :  { %2121 = vmatprep.subr.bf16.mxu0 %v2404_v0  ;;  %2265 = vmatprep.subr.bf16.mxu1 %v2404_v0 }
  0xc0   :  { %2123 = vmatpush3.bf16.msra.mxu0 %v2618_v44  ;;  %2267 = vmatpush3.bf16.msra.mxu1 %v2618_v44 }
  0xc1   :  { %2124 = vmatprep.subr.bf16.mxu0 %v2404_v0  ;;  %2268 = vmatprep.subr.bf16.mxu1 %v2404_v0 }
  0xc4   :  { %2126 = vmatpush3.bf16.msra.mxu0 %v2620_v45  ;;  %2270 = vmatpush3.bf16.msra.mxu1 %v2620_v45 }
  0xc5   :  { %2127 = vmatprep.subr.bf16.mxu0 %v2404_v0  ;;  %2271 = vmatprep.subr.bf16.mxu1 %v2404_v0 }
  0xc8   :  { %2129 = vmatpush3.bf16.msra.mxu0 %v2626_v47  ;;  %2273 = vmatpush3.bf16.msra.mxu1 %v2626_v47 }
  0xc9   :  { %2130 = vmatprep.subr.bf16.mxu0 %v2404_v0  ;;  %2274 = vmatprep.subr.bf16.mxu1 %v2404_v0 }
  0xcb   :  { %1763 = vmatmul.mubr.f32.vlgmr.msra.gmra.mrb[0].mxu0 %v2499_v24  ;;  %1973 = vmatmul.mubr.f32.vlgmr.msra.gmra.mrb[0].mxu1 %v2519_v41 }
  0xcc   :  { %2132 = vmatpush3.bf16.msra.mxu0 %v2474_v12  ;;  %2276 = vmatpush3.bf16.msra.mxu1 %v2474_v12 }
  0xcd   :  { %2133 = vmatprep.subr.bf16.mxu0 %v2404_v0  ;;  %2277 = vmatprep.subr.bf16.mxu1 %v2404_v0 }
  0xce   :  { %1797 = vmatprep.mubr.msk.f32.mxu0 %vm2405_vm0, %v2406_v1  ;;  %2007 = vmatprep.mubr.msk.f32.mxu1 %vm2405_vm0, %v2406_v1 }
  0xd0   :  { %2135 = vmatpush3.bf16.msra.mxu0 %v2478_v13  ;;  %2279 = vmatpush3.bf16.msra.mxu1 %v2478_v13 }
  0xd1   :  { %2136 = vmatprep.subr.bf16.mxu0 %v2404_v0  ;;  %2280 = vmatprep.subr.bf16.mxu1 %v2404_v0 }
  0xd4   :  { %2138 = vmatpush3.bf16.msra.mxu0 %v2492_v19  ;;  %2282 = vmatpush3.bf16.msra.mxu1 %v2492_v19 }
  0xd5   :  { %2139 = vmatprep.subr.bf16.mxu0 %v2404_v0  ;;  %2283 = vmatprep.subr.bf16.mxu1 %v2404_v0 }
  0xd8   :  { %2141 = vmatpush3.bf16.msra.mxu0 %v2505_v29  ;;  %2285 = vmatpush3.bf16.msra.mxu1 %v2505_v29 }
  0xd9   :  { %2142 = vmatprep.subr.bf16.mxu0 %v2404_v0  ;;  %2286 = vmatprep.subr.bf16.mxu1 %v2404_v0 }
  0xdc   :  { %2144 = vmatpush3.bf16.msra.mxu0 %v2523_v46  ;;  %2288 = vmatpush3.bf16.msra.mxu1 %v2523_v46 }
  0xdd   :  { %2145 = vmatprep.subr.bf16.mxu0 %v2404_v0  ;;  %2289 = vmatprep.subr.bf16.mxu1 %v2404_v0 }
  0xe0   :  { %2147 = vmatpush3.bf16.msra.mxu0 %v2536_v53  ;;  %2291 = vmatpush3.bf16.msra.mxu1 %v2536_v53 }
  0xe1   :  { %2148 = vmatprep.subr.bf16.mxu0 %v2404_v0  ;;  %2292 = vmatprep.subr.bf16.mxu1 %v2404_v0 }
  0xe4   :  { %2150 = vmatpush3.bf16.msra.mxu0 %v2538_v54  ;;  %2294 = vmatpush3.bf16.msra.mxu1 %v2538_v54  ;;  %v1384_v54 = vld [vmem:[%s2843_s1] ss:$0 sm:$0xff] }
  0xe5   :  { %2151 = vmatprep.subr.bf16.mxu0 %v2404_v0  ;;  %2295 = vmatprep.subr.bf16.mxu1 %v2404_v0 }
  0xe8   :  { %2153 = vmatpush3.bf16.msra.mxu0 %v2540_v55  ;;  %2297 = vmatpush3.bf16.msra.mxu1 %v2540_v55 }
  0xeb   :  { %1798 = vmatmul.mubr.f32.vlgmr.msra.gmra.mrb[0].mxu0 %v2499_v24  ;;  %2008 = vmatmul.mubr.f32.vlgmr.msra.gmra.mrb[0].mxu1 %v2519_v41  ;;  %v1385_v24 = vld [vmem:[%s2844_s2] ss:$0 sm:$0xff] }
 0x1be   :  { %v699_v1 = vpop.f32.mrb[0].mxu0  ;;  %v1340_v12 = vpop.f32.mrb[0].mxu1 }
 0x1bf   :  { %v1344_v13 = vmul.f32 %v699_v1, %v699_v1  ;;  %v1799_v19 = vpop.f32.mrb[1].mxu0  ;;  %v2009_v29 = vpop.f32.mrb[1].mxu1  ;;  %v1347_v53 = vsub.f32 %v2488_v18, %v699_v1 }
 0x1c1   :  { %v1345_v36 = vsub.f32 %v1340_v12, %v1344_v13 }
 0x1c3   :  { %v1346_v46 = vmax.f32 %v1345_v36, 0.0 }
 0x1c5   :  { %v1348_v52 = vadd.f32 1e-05, %v1346_v46 }
 0x1c7   :  { %2326 = vrsqrt.f32 %v1348_v52 }
 0x1d1   :  { %v2327_v0 = vpop.eup %2326 }
 0x1d2   :  { %v1350_v55 = vmul.f32 %v2327_v0, %v1347_v53 }
 0x1d4   :  { %v1358_v41 = vmul.f32 %v1384_v54, %v1350_v55 }
 0x1d6   :  { %v1366_v4 = vadd.f32 %v1385_v24, %v1358_v41 }
 0x1d8   :  { %1367 = vst [vmem:[#allocation7] sm:$0x7f] %v1366_v4 }
 0x1d9   :  { %2383 = shalt.err (!%p2380_p6)
}
 0x1da   :  { %s2384_s21 = scalar_lea.hbm %s2846_s4, 128 }
 0x1db   :  { %p2385_p7 = scmp.ne.s32.totalorder %s2846_s4, %s2384_s21  ;;  %p2388_p8 = scmp.lt.u32.totalorder %s2384_s21, %s2846_s4 }
 0x1dd   :  { %p2390_p9 = pnand %p2388_p8, %p2385_p7 }
 0x1df   :  { %2393 = shalt.err (!%p2390_p9)
}
 0x1e0   :  { %1377 = dma.vmem_to_hbm [thread:$0]  %s1375_s18, 128, %s2846_s4, [#allocation4]  }
 0x1e1   :  { %2398 = dma.done.wait [#allocation4], 128  }
 0x1e2   :  { %2399 = vsyncadd [#allocation4], 4294967168 }
 0x1e3   :  { %1381 = vsyncpa [#allocation3], 1 }
 0x1e4   :  { %1382 = vsyncpa [#allocation6], 1 }
 0x1e5   :  { %1383 = vsyncpa [#allocation4], 1 }

</bundles_post_ra>
